<compile_context>
chip_gen: v5e
topology: v5e:2x2
jax: 0.10.0
libtpu: 0.0.40
codegen_flags: <defaults>
</compile_context>

<pallas_src>
import jax
import jax.numpy as jnp
from jax.experimental import pallas as pl
from jax.experimental.pallas import tpu as pltpu


def _neural_kernel(state_ref, w1_ref, b1_ref, w2_ref, b2_ref, out_ref):
    # Two MXU matmuls + VPU relu / bias adds, all on VMEM-resident tiles.
    x = state_ref[...]                                                  # (TB, P) f32
    h = jnp.dot(x, w1_ref[...], preferred_element_type=jnp.float32) + b1_ref[...]
    h = jnp.maximum(h, 0.0)                                             # ReLU
    q = jnp.dot(h, w2_ref[...], preferred_element_type=jnp.float32) + b2_ref[...]
    out_ref[...] = q.astype(out_ref.dtype)                              # (TB, A) store


def neural_forward(state, w1_t, b1, w2_t, b2, *, tb=4096):
    """Forward pass of `Neural`.

    state: (B, P) f32
    w1_t : (P, 30) f32   (p1.weight transposed)
    b1   : (1, 30) f32
    w2_t : (30, A) f32   (p2.weight transposed)
    b2   : (1, A) f32
    returns (B, A) f32
    """
    B, P = state.shape
    H = w1_t.shape[1]
    A = w2_t.shape[1]

    # Batch tiling: single full-array block for small B (block dims equal to
    # the array extent are always legal); otherwise a sublane-aligned TB with
    # a cdiv grid and a masked ragged tail (no host-side padding copies).
    if B <= tb:
        TB = B
        grid = (1,)
    else:
        TB = max(8, (tb // 8) * 8)          # second-minor block dim: multiple of 8
        grid = (pl.cdiv(B, TB),)

    out = pl.pallas_call(
        _neural_kernel,
        out_shape=jax.ShapeDtypeStruct((B, A), jnp.float32),
        grid_spec=pl.GridSpec(
            grid=grid,
            in_specs=[
                pl.BlockSpec((TB, P), lambda i: (i, 0)),   # state tile, pipelined
                pl.BlockSpec((P, H), lambda i: (0, 0)),    # w1: VMEM-resident
                pl.BlockSpec((1, H), lambda i: (0, 0)),    # b1: VMEM-resident
                pl.BlockSpec((H, A), lambda i: (0, 0)),    # w2: VMEM-resident
                pl.BlockSpec((1, A), lambda i: (0, 0)),    # b2: VMEM-resident
            ],
            out_specs=pl.BlockSpec((TB, A), lambda i: (i, 0)),
        ),
        compiler_params=pltpu.CompilerParams(
            dimension_semantics=("parallel",),   # shards batch tiles across TCs on v7x
            # Explicit VMEM budget: ~6 * TB * 512 B (lane-padded state/out double
            # buffers + hidden temporaries) ~= 12 MiB at TB=4096. 32 MiB is safe
            # on v5e (128 MiB phys), v6e (128 MiB) and v7x (64 MiB phys).
            vmem_limit_bytes=32 * 1024 * 1024,
        ),
    )(state, w1_t, b1, w2_t, b2)

    return out


def init_neural_params(key, parameter_size, action_nn, hidden=30):
    """Deterministic PyTorch-style (uniform +/- 1/sqrt(fan_in)) initialization."""
    k1, k2, k3, k4 = jax.random.split(key, 4)
    bound1 = 1.0 / jnp.sqrt(jnp.float32(parameter_size))
    bound2 = 1.0 / jnp.sqrt(jnp.float32(hidden))
    # stored pre-transposed: (in, out)
    w1_t = jax.random.uniform(k1, (parameter_size, hidden), jnp.float32, -bound1, bound1)
    b1 = jax.random.uniform(k2, (1, hidden), jnp.float32, -bound1, bound1)
    w2_t = jax.random.uniform(k3, (hidden, action_nn), jnp.float32, -bound2, bound2)
    b2 = jax.random.uniform(k4, (1, action_nn), jnp.float32, -bound2, bound2)
    return w1_t, b1, w2_t, b2


if __name__ == "__main__":
    parameter_size = 8
    action_nn = 4
    batch = 2

    key = jax.random.PRNGKey(0)
    k_state, k_params = jax.random.split(key)

    state = jax.random.normal(k_state, (batch, parameter_size), jnp.float32)
    w1_t, b1, w2_t, b2 = init_neural_params(k_params, parameter_size, action_nn)

    qval = neural_forward(state, w1_t, b1, w2_t, b2)
    qval = jax.block_until_ready(qval)

    # pure-JAX reference check (small batch, single grid step)
    ref = jnp.maximum(state @ w1_t + b1, 0.0) @ w2_t + b2
    assert qval.shape == (batch, action_nn)
    assert jnp.allclose(qval, ref, atol=1e-5, rtol=1e-5)

    # exercise the tiled multi-step path including a ragged tail block
    big_B = 10000  # not a multiple of TB=4096 -> grid=3 with a partial last block
    big_state = jax.random.normal(jax.random.PRNGKey(1), (big_B, parameter_size), jnp.float32)
    big_q = jax.block_until_ready(neural_forward(big_state, w1_t, b1, w2_t, b2))
    big_ref = jnp.maximum(big_state @ w1_t + b1, 0.0) @ w2_t + b2
    assert big_q.shape == (big_B, action_nn)
    assert jnp.allclose(big_q, big_ref, atol=1e-4, rtol=1e-4)

    print("KERNEL_OK")
</pallas_src>

<mosaic_0001>
module attributes {stable_mosaic.version = 11 : i64} {
  func.func @_neural_kernel(%arg0: i32, %arg1: memref<2x8xf32, #tpu.memory_space<vmem>>, %arg2: memref<8x30xf32, #tpu.memory_space<vmem>>, %arg3: memref<1x30xf32, #tpu.memory_space<vmem>>, %arg4: memref<30x4xf32, #tpu.memory_space<vmem>>, %arg5: memref<1x4xf32, #tpu.memory_space<vmem>>, %arg6: memref<2x4xf32, #tpu.memory_space<vmem>>) attributes {dimension_semantics = [#tpu.dimension_semantics<parallel>], iteration_bounds = array<i64: 1>, scalar_prefetch = 0 : i64, scratch_operands = 0 : i64, tpu.core_type = #tpu.core_type<tc>, window_params = [{transform_indices = @transform_0, window_bounds = array<i64: 2, 8>}, {pipeline_mode = #tpu.pipeline_mode<synchronous>, transform_indices = @transform_1, window_bounds = array<i64: 8, 30>}, {pipeline_mode = #tpu.pipeline_mode<synchronous>, transform_indices = @transform_2, window_bounds = array<i64: 1, 30>}, {pipeline_mode = #tpu.pipeline_mode<synchronous>, transform_indices = @transform_3, window_bounds = array<i64: 30, 4>}, {pipeline_mode = #tpu.pipeline_mode<synchronous>, transform_indices = @transform_4, window_bounds = array<i64: 1, 4>}, {transform_indices = @transform_5, window_bounds = array<i64: 2, 4>}]} {
    %c0 = arith.constant 0 : index
    %c0_0 = arith.constant 0 : index
    %0 = vector.load %arg1[%c0, %c0_0] : memref<2x8xf32, #tpu.memory_space<vmem>>, vector<2x8xf32>
    %c0_1 = arith.constant 0 : index
    %c0_2 = arith.constant 0 : index
    %1 = vector.load %arg2[%c0_1, %c0_2] : memref<8x30xf32, #tpu.memory_space<vmem>>, vector<8x30xf32>
    %cst = arith.constant dense<0.000000e+00> : vector<2x30xf32>
    %2 = tpu.matmul %0, %1, %cst {dimension_numbers = #tpu.dot_dimension_numbers<[1], [0], [0], [1], [0, 0, 1, 1], [], []>} : vector<2x8xf32>, vector<8x30xf32>, vector<2x30xf32> -> vector<2x30xf32>
    %c0_3 = arith.constant 0 : index
    %c0_4 = arith.constant 0 : index
    %3 = vector.load %arg3[%c0_3, %c0_4] : memref<1x30xf32, #tpu.memory_space<vmem>>, vector<1x30xf32>
    %4 = vector.broadcast %3 : vector<1x30xf32> to vector<2x30xf32>
    %5 = arith.addf %2, %4 : vector<2x30xf32>
    %cst_5 = arith.constant 0.000000e+00 : f32
    %6 = vector.broadcast %cst_5 : f32 to vector<2x30xf32>
    %7 = arith.maximumf %5, %6 : vector<2x30xf32>
    %c0_6 = arith.constant 0 : index
    %c0_7 = arith.constant 0 : index
    %8 = vector.load %arg4[%c0_6, %c0_7] : memref<30x4xf32, #tpu.memory_space<vmem>>, vector<30x4xf32>
    %cst_8 = arith.constant dense<0.000000e+00> : vector<2x4xf32>
    %9 = tpu.matmul %7, %8, %cst_8 {dimension_numbers = #tpu.dot_dimension_numbers<[1], [0], [0], [1], [0, 0, 1, 1], [], []>} : vector<2x30xf32>, vector<30x4xf32>, vector<2x4xf32> -> vector<2x4xf32>
    %c0_9 = arith.constant 0 : index
    %c0_10 = arith.constant 0 : index
    %10 = vector.load %arg5[%c0_9, %c0_10] : memref<1x4xf32, #tpu.memory_space<vmem>>, vector<1x4xf32>
    %11 = vector.broadcast %10 : vector<1x4xf32> to vector<2x4xf32>
    %12 = arith.addf %9, %11 : vector<2x4xf32>
    %c0_11 = arith.constant 0 : index
    %c0_12 = arith.constant 0 : index
    %13 = vector.load %arg6[%c0_11, %c0_12] : memref<2x4xf32, #tpu.memory_space<vmem>>, vector<2x4xf32>
    tpu.vector_store %arg6[%c0_11, %c0_12], %12 {strides = array<i32>} : memref<2x4xf32, #tpu.memory_space<vmem>>, vector<2x4xf32>,
    return
  }
  func.func @transform_0(%arg0: i32) -> (i32, i32) {
    %c0_i32 = arith.constant 0 : i32
    %c0_i32_0 = arith.constant 0 : i32
    return %arg0, %c0_i32 : i32, i32
  }
  func.func @transform_1(%arg0: i32) -> (i32, i32) {
    %c0_i32 = arith.constant 0 : i32
    %c0_i32_0 = arith.constant 0 : i32
    %c0_i32_1 = arith.constant 0 : i32
    return %c0_i32, %c0_i32_0 : i32, i32
  }
  func.func @transform_2(%arg0: i32) -> (i32, i32) {
    %c0_i32 = arith.constant 0 : i32
    %c0_i32_0 = arith.constant 0 : i32
    %c0_i32_1 = arith.constant 0 : i32
    return %c0_i32, %c0_i32_0 : i32, i32
  }
  func.func @transform_3(%arg0: i32) -> (i32, i32) {
    %c0_i32 = arith.constant 0 : i32
    %c0_i32_0 = arith.constant 0 : i32
    %c0_i32_1 = arith.constant 0 : i32
    return %c0_i32, %c0_i32_0 : i32, i32
  }
  func.func @transform_4(%arg0: i32) -> (i32, i32) {
    %c0_i32 = arith.constant 0 : i32
    %c0_i32_0 = arith.constant 0 : i32
    %c0_i32_1 = arith.constant 0 : i32
    return %c0_i32, %c0_i32_0 : i32, i32
  }
  func.func @transform_5(%arg0: i32) -> (i32, i32) {
    %c0_i32 = arith.constant 0 : i32
    %c0_i32_0 = arith.constant 0 : i32
    return %arg0, %c0_i32 : i32, i32
  }
}

</mosaic_0001>

<bundles_post_ra>
// kernel: tpu_custom_call.1
= control target key start
LH: loop header
LB: loop body
LE: loop exit
PB: predicated region body
PF: predicated region fallthrough
CT: control target
= control target key end

     0   :  { %vm27_vm0 = vcmask 64512   ;;  %vm64_vm1 = vcmask 1045504   ;;  %s196_s0 = inlined_call_operand.vmem [shape: f32[2,8], index: 0, kind: input, shape index: {}]   ;;  %s197_s1 = inlined_call_operand.vmem [shape: f32[8,30], index: 1, kind: input, shape index: {}]   ;;  %s198_s2 = inlined_call_operand.vmem [shape: f32[1,30], index: 2, kind: input, shape index: {}]   ;;  %s199_s3 = inlined_call_operand.vmem [shape: f32[30,4], index: 3, kind: input, shape index: {}]   ;;  %s200_s4 = inlined_call_operand.vmem [shape: f32[1,4], index: 4, kind: input, shape index: {}]   ;;  %s201_s5 = inlined_call_operand.hbm [shape: f32[2,4], index: 5, kind: output, shape index: {}]  }
   0x1   :  { %v22_v0 = vld [vmem:[%s197_s1] sm:$0xff]  ;;  %v55_v2 = vld [vmem:[%s199_s3 + $0x18] sm:$0x3f] }
   0x2   :  { %v21_v1 = vld [vmem:[%s196_s0] sm:$0x3]  ;;  %46 = vmatpush.msra.mxu0 %v22_v0  ;;  %107 = vmatpush.msk.msra.mxu1 %vm64_vm1, %v55_v2 }
   0x3   :  { %106 = vmatmul.msk.f32.vlgmr.msra.gmra.mxu0 %vm27_vm0, %v21_v1 }
   0x4   :  { %10 = vsyncpa [#allocation3], 0  ;;  %v54_v3 = vld [vmem:[%s199_s3 + $0x10] sm:$0xff]  ;;  %v53_v4 = vld [vmem:[%s199_s3 + $0x8] sm:$0xff]  ;;  %vm60_vm2 = vcmask 244736   ;;  %s138_s7 = smov [#allocation2]  }
   0x5   :  { %81 = vmatpush.msra.mxu1 %v54_v3  ;;  %v52_v5 = vld [vmem:[%s199_s3] sm:$0xff]  ;;  %s95_s8 = sshll.u32 %s138_s7, 4  ;;  %s97_s3 = sshll.u32 %s201_s5, 4  ;;  %vm88_vm3 = vcmask 25600   ;;  %s96_s8 = int_to_ptr.vmem [resolvable:$true] %s95_s8  ;;  %s98_s3 = int_to_ptr.hbm [resolvable:$true] %s97_s3 }
   0x6   :  { %v110_v6 = vld [vmem:[%s198_s2] ss:$0 sm:$0xff] }
   0x7   :  { %82 = vmatpush.msra.mxu1 %v53_v4  ;;  %v111_v10 = vld [vmem:[%s200_s4] ss:$0 sm:$0xff] }
   0x9   :  { %83 = vmatpush.msra.mxu1 %v52_v5 }
  0x80   :  { %v48_v7 = vpop.f32.mrf.mxu0 }
  0x81   :  { %v49_v8 = vadd.f32 %v110_v6, %v48_v7 }
  0x83   :  { %v51_v9 = vmax.f32 %v49_v8, 0.0 }
  0x85   :  { %108 = vmatmul.msk.f32.vlgmr.msra.gmra.mxu1 %vm60_vm2, %v51_v9 }
 0x102   :  { %v85_v11 = vpop.f32.mrf.mxu1 }
 0x103   :  { %v86_v12 = vadd.f32 %v111_v10, %v85_v11 }
 0x105   :  { %89 = vst.msk [vmem:[#allocation2] sm:$0x3] %vm88_vm3, %v86_v12 }
 0x106   :  { %100 = dma.vmem_to_hbm [thread:$0]  %s96_s8, 32, %s98_s3, [#allocation3]  }
 0x107   :  { %136 = dma.done.wait [#allocation3], 32  }
 0x108   :  { %137 = vsyncadd [#allocation3], 4294967264 }
 0x109   :  { %105 = vsyncpa [#allocation3], 1 }

</bundles_post_ra>
